<compile_context>
chip_gen: v7x
topology: tpu7x:2x2x1
jax: 0.10.0
libtpu: 0.0.40
codegen_flags: <defaults>
</compile_context>

<pallas_src>
import functools

import jax
import jax.numpy as jnp
from jax.experimental import pallas as pl
from jax.experimental.pallas import tpu as pltpu


# ----------------------------- kernel ---------------------------------------


def _layer_norm(x, gamma, beta, eps=1e-5):
    mu = jnp.mean(x, axis=-1, keepdims=True)
    var = jnp.mean((x - mu) ** 2, axis=-1, keepdims=True)
    return (x - mu) * jax.lax.rsqrt(var + eps) * gamma + beta


def _block_kernel(n_head,
                  x_ref,
                  w_in_ref, b_in_ref, w_out_ref, b_out_ref,
                  g1_ref, be1_ref, g2_ref, be2_ref,
                  w_fc_ref, b_fc_ref, w_proj_ref, b_proj_ref,
                  o_ref):
    NB, L, D = x_ref.shape
    dh = D // n_head
    scale = 1.0 / (dh ** 0.5)
    cdt = w_in_ref.dtype                 # matmul operand dtype (f32 or bf16)

    # Flatten batch*seq into one row axis: LayerNorm and every projection are
    # row-wise, so 2-D (rows, features) matmuls keep the MXU lane-dense and
    # avoid rank-3 dot_generals where they aren't needed.
    x = x_ref[...].astype(jnp.float32).reshape(NB * L, D)

    # -------------- attention branch: x + out_proj(MHA(ln_1(x))) -------------
    h = _layer_norm(x, g1_ref[...], be1_ref[...])
    qkv = jnp.dot(h.astype(cdt), w_in_ref[...],
                  preferred_element_type=jnp.float32) + b_in_ref[...]
    # Fold 1/sqrt(dh) into q once ((rows, D) multiply instead of per-head (L,L)).
    q = (qkv[:, 0 * D:1 * D] * scale).astype(cdt)
    k = qkv[:, 1 * D:2 * D].astype(cdt)
    v = qkv[:, 2 * D:3 * D].astype(cdt)

    w_out = w_out_ref[...]               # (D, D), already transposed in wrapper

    # Static per-head loop.  Heads cannot be folded into a leading batch dim
    # without a second-minor transpose / multi-batch-dim dot_general (which
    # Mosaic does not lower cleanly), so we keep the single-batch-dim einsum
    # pattern and fold the former head-concat into the output projection.
    attn = jnp.zeros((NB * L, D), jnp.float32)
    for hd in range(n_head):
        lo = hd * dh
        qh = q[:, lo:lo + dh].reshape(NB, L, dh)
        kh = k[:, lo:lo + dh].reshape(NB, L, dh)
        vh = v[:, lo:lo + dh].reshape(NB, L, dh)
        s = jnp.einsum("bld,bmd->blm", qh, kh,
                       preferred_element_type=jnp.float32)          # (NB,L,L)
        s = s - jnp.max(s, axis=-1, keepdims=True)
        p = jnp.exp(s)
        p = p * pl.reciprocal(jnp.sum(p, axis=-1, keepdims=True), approx=True)
        oh = jnp.einsum("blm,bmd->bld", p.astype(cdt), vh,
                        preferred_element_type=jnp.float32)         # (NB,L,dh)
        attn = attn + jnp.dot(oh.reshape(NB * L, dh).astype(cdt),
                              w_out[lo:lo + dh, :],
                              preferred_element_type=jnp.float32)
    x = x + attn + b_out_ref[...]
    # TODO(synk): attn_mask / key_padding_mask support (module default is None).

    # -------------- MLP branch: x + c_proj(QuickGELU(c_fc(ln_2(x)))) ---------
    # TODO(synk): for CLIP-scale D, stream w_fc/w_proj over a 4D-hidden grid
    # axis with an f32 accumulator (VMEM budget on v7x) and flash-tile over KV
    # for long sequences.
    h2 = _layer_norm(x, g2_ref[...], be2_ref[...])
    fc = jnp.dot(h2.astype(cdt), w_fc_ref[...],
                 preferred_element_type=jnp.float32) + b_fc_ref[...]
    fc = fc * jax.nn.sigmoid(1.702 * fc)          # QuickGELU
    proj = jnp.dot(fc.astype(cdt), w_proj_ref[...],
                   preferred_element_type=jnp.float32) + b_proj_ref[...]
    x = x + proj

    o_ref[...] = x.reshape(NB, L, D).astype(o_ref.dtype)


# ----------------------------- wrapper ---------------------------------------


def residual_attention_block(x_lnd, params, n_head, *,
                             compute_dtype=jnp.float32,
                             max_block_batch=8):
    """x_lnd: (seq, batch, d_model), the torch.nn.MultiheadAttention layout.

    `compute_dtype=jnp.bfloat16` feeds bf16 operands to the MXU (f32 accum)
    on v6e/v7x; LayerNorm / softmax / residual math stays f32 either way.
    """
    L, N, D = x_lnd.shape

    # Conscious HBM-pass tax; see module docstring.
    xb = jnp.transpose(x_lnd, (1, 0, 2))          # (N, L, D)

    # Pre-transpose PyTorch (out_features, in_features) weights once so the
    # kernel never materializes a `.T` per grid step.
    w_in = jnp.transpose(params["w_in"]).astype(compute_dtype)      # (D, 3D)
    w_out = jnp.transpose(params["w_out"]).astype(compute_dtype)    # (D, D)
    w_fc = jnp.transpose(params["w_fc"]).astype(compute_dtype)      # (D, 4D)
    w_proj = jnp.transpose(params["w_proj"]).astype(compute_dtype)  # (4D, D)

    weights = [w_in, params["b_in"], w_out, params["b_out"],
               params["ln1_g"], params["ln1_b"],
               params["ln2_g"], params["ln2_b"],
               w_fc, params["b_fc"], w_proj, params["b_proj"]]

    nb = min(N, max_block_batch)                  # batch elements per grid step
    grid = (pl.cdiv(N, nb),)

    def full_spec(a):
        nd = a.ndim
        # Constant block index -> weight stays VMEM-resident across grid steps.
        return pl.BlockSpec(a.shape, lambda b, _nd=nd: (0,) * _nd)

    in_specs = ([pl.BlockSpec((nb, L, D), lambda b: (b, 0, 0))]
                + [full_spec(w) for w in weights])

    out = pl.pallas_call(
        functools.partial(_block_kernel, n_head),
        out_shape=jax.ShapeDtypeStruct((N, L, D), x_lnd.dtype),
        grid_spec=pltpu.PrefetchScalarGridSpec(
            num_scalar_prefetch=0,
            grid=grid,
            in_specs=in_specs,
            out_specs=pl.BlockSpec((nb, L, D), lambda b: (b, 0, 0)),
        ),
        compiler_params=pltpu.CompilerParams(
            # Batch axis is embarrassingly parallel -> shards across both
            # TensorCores on v7x; no effect on single-TC v5e/v6e.
            dimension_semantics=("parallel",)),
    )(xb, *weights)

    return jnp.transpose(out, (1, 0, 2))          # back to (L, N, D)


# ----------------------------- reference (plain JAX) --------------------------


def reference(x, p, n_head):
    L, N, D = x.shape
    dh = D // n_head
    h = _layer_norm(x, p["ln1_g"], p["ln1_b"])
    qkv = h @ p["w_in"].T + p["b_in"]
    q, k, v = jnp.split(qkv, 3, axis=-1)

    def split_heads(t):
        return t.reshape(L, N, n_head, dh).transpose(1, 2, 0, 3)   # (N,H,L,dh)

    qh, kh, vh = map(split_heads, (q, k, v))
    s = jnp.einsum("nhqd,nhkd->nhqk", qh, kh) / jnp.sqrt(dh)
    a = jax.nn.softmax(s, axis=-1)
    o = jnp.einsum("nhqk,nhkd->nhqd", a, vh).transpose(2, 0, 1, 3).reshape(L, N, D)
    x = x + (o @ p["w_out"].T + p["b_out"])
    h2 = _layer_norm(x, p["ln2_g"], p["ln2_b"])
    fc = h2 @ p["w_fc"].T + p["b_fc"]
    fc = fc * jax.nn.sigmoid(1.702 * fc)
    return x + (fc @ p["w_proj"].T + p["b_proj"])


# ----------------------------- main -------------------------------------------

if __name__ == "__main__":
    L, N, D, H = 8, 2, 32, 4                       # seq, batch, d_model, n_head

    key = jax.random.PRNGKey(0)
    ks = jax.random.split(key, 12)

    params = {
        # MultiheadAttention packed in-projection + out-projection (torch layout)
        "w_in":   0.05 * jax.random.normal(ks[0], (3 * D, D), jnp.float32),
        "b_in":   0.05 * jax.random.normal(ks[1], (1, 3 * D), jnp.float32),
        "w_out":  0.05 * jax.random.normal(ks[2], (D, D), jnp.float32),
        "b_out":  0.05 * jax.random.normal(ks[3], (1, D), jnp.float32),
        # LayerNorms
        "ln1_g":  1.0 + 0.1 * jax.random.normal(ks[4], (1, D), jnp.float32),
        "ln1_b":  0.1 * jax.random.normal(ks[5], (1, D), jnp.float32),
        "ln2_g":  1.0 + 0.1 * jax.random.normal(ks[6], (1, D), jnp.float32),
        "ln2_b":  0.1 * jax.random.normal(ks[7], (1, D), jnp.float32),
        # MLP (c_fc: D -> 4D, c_proj: 4D -> D)
        "w_fc":   0.05 * jax.random.normal(ks[8], (4 * D, D), jnp.float32),
        "b_fc":   0.05 * jax.random.normal(ks[9], (1, 4 * D), jnp.float32),
        "w_proj": 0.05 * jax.random.normal(ks[10], (D, 4 * D), jnp.float32),
        "b_proj": 0.05 * jax.random.normal(ks[11], (1, D), jnp.float32),
    }

    x = jax.random.normal(jax.random.PRNGKey(42), (L, N, D), jnp.float32)

    y = residual_attention_block(x, params, H)
    y = jax.block_until_ready(y)

    y_ref = reference(x, params, H)
    assert y.shape == (L, N, D)
    # tolerance covers the approx-EUP reciprocal in the softmax denominator
    assert jnp.allclose(y, y_ref, atol=2e-3, rtol=2e-3), (
        float(jnp.max(jnp.abs(y - y_ref))))

    print("KERNEL_OK")
</pallas_src>

<mosaic_0001>
module attributes {stable_mosaic.version = 11 : i64} {
  func.func @_block_kernel(%arg0: i32, %arg1: memref<2x8x32xf32, #tpu.memory_space<vmem>>, %arg2: memref<32x96xf32, #tpu.memory_space<vmem>>, %arg3: memref<1x96xf32, #tpu.memory_space<vmem>>, %arg4: memref<32x32xf32, #tpu.memory_space<vmem>>, %arg5: memref<1x32xf32, #tpu.memory_space<vmem>>, %arg6: memref<1x32xf32, #tpu.memory_space<vmem>>, %arg7: memref<1x32xf32, #tpu.memory_space<vmem>>, %arg8: memref<1x32xf32, #tpu.memory_space<vmem>>, %arg9: memref<1x32xf32, #tpu.memory_space<vmem>>, %arg10: memref<32x128xf32, #tpu.memory_space<vmem>>, %arg11: memref<1x128xf32, #tpu.memory_space<vmem>>, %arg12: memref<128x32xf32, #tpu.memory_space<vmem>>, %arg13: memref<1x32xf32, #tpu.memory_space<vmem>>, %arg14: memref<2x8x32xf32, #tpu.memory_space<vmem>>) attributes {dimension_semantics = [#tpu.dimension_semantics<parallel>], iteration_bounds = array<i64: 1>, scalar_prefetch = 0 : i64, scratch_operands = 0 : i64, tpu.core_type = #tpu.core_type<tc>, window_params = [{transform_indices = @transform_0, window_bounds = array<i64: 2, 8, 32>}, {pipeline_mode = #tpu.pipeline_mode<synchronous>, transform_indices = @transform_1, window_bounds = array<i64: 32, 96>}, {pipeline_mode = #tpu.pipeline_mode<synchronous>, transform_indices = @transform_2, window_bounds = array<i64: 1, 96>}, {pipeline_mode = #tpu.pipeline_mode<synchronous>, transform_indices = @transform_3, window_bounds = array<i64: 32, 32>}, {pipeline_mode = #tpu.pipeline_mode<synchronous>, transform_indices = @transform_4, window_bounds = array<i64: 1, 32>}, {pipeline_mode = #tpu.pipeline_mode<synchronous>, transform_indices = @transform_5, window_bounds = array<i64: 1, 32>}, {pipeline_mode = #tpu.pipeline_mode<synchronous>, transform_indices = @transform_6, window_bounds = array<i64: 1, 32>}, {pipeline_mode = #tpu.pipeline_mode<synchronous>, transform_indices = @transform_7, window_bounds = array<i64: 1, 32>}, {pipeline_mode = #tpu.pipeline_mode<synchronous>, transform_indices = @transform_8, window_bounds = array<i64: 1, 32>}, {pipeline_mode = #tpu.pipeline_mode<synchronous>, transform_indices = @transform_9, window_bounds = array<i64: 32, 128>}, {pipeline_mode = #tpu.pipeline_mode<synchronous>, transform_indices = @transform_10, window_bounds = array<i64: 1, 128>}, {pipeline_mode = #tpu.pipeline_mode<synchronous>, transform_indices = @transform_11, window_bounds = array<i64: 128, 32>}, {pipeline_mode = #tpu.pipeline_mode<synchronous>, transform_indices = @transform_12, window_bounds = array<i64: 1, 32>}, {transform_indices = @transform_13, window_bounds = array<i64: 2, 8, 32>}]} {
    %c0 = arith.constant 0 : index
    %c0_0 = arith.constant 0 : index
    %c0_1 = arith.constant 0 : index
    %0 = vector.load %arg1[%c0, %c0_0, %c0_1] : memref<2x8x32xf32, #tpu.memory_space<vmem>>, vector<2x8x32xf32>
    %1 = vector.shape_cast %0 : vector<2x8x32xf32> to vector<16x32xf32>
    %c0_2 = arith.constant 0 : index
    %c0_3 = arith.constant 0 : index
    %2 = vector.load %arg6[%c0_2, %c0_3] : memref<1x32xf32, #tpu.memory_space<vmem>>, vector<1x32xf32>
    %c0_4 = arith.constant 0 : index
    %c0_5 = arith.constant 0 : index
    %3 = vector.load %arg7[%c0_4, %c0_5] : memref<1x32xf32, #tpu.memory_space<vmem>>, vector<1x32xf32>
    %cst = arith.constant dense<0.000000e+00> : vector<16xf32>
    %4 = vector.multi_reduction <add>, %1, %cst [1] : vector<16x32xf32> to vector<16xf32>
    %5 = vector.shape_cast %4 : vector<16xf32> to vector<16x1xf32>
    %cst_6 = arith.constant 3.200000e+01 : f32
    %6 = vector.broadcast %cst_6 : f32 to vector<16x1xf32>
    %7 = arith.divf %5, %6 : vector<16x1xf32>
    %8 = vector.broadcast %7 : vector<16x1xf32> to vector<16x32xf32>
    %9 = arith.subf %1, %8 : vector<16x32xf32>
    %10 = arith.mulf %9, %9 : vector<16x32xf32>
    %cst_7 = arith.constant dense<0.000000e+00> : vector<16xf32>
    %11 = vector.multi_reduction <add>, %10, %cst_7 [1] : vector<16x32xf32> to vector<16xf32>
    %12 = vector.shape_cast %11 : vector<16xf32> to vector<16x1xf32>
    %cst_8 = arith.constant 3.200000e+01 : f32
    %13 = vector.broadcast %cst_8 : f32 to vector<16x1xf32>
    %14 = arith.divf %12, %13 : vector<16x1xf32>
    %15 = vector.broadcast %7 : vector<16x1xf32> to vector<16x32xf32>
    %16 = arith.subf %1, %15 : vector<16x32xf32>
    %cst_9 = arith.constant 9.99999974E-6 : f32
    %17 = vector.broadcast %cst_9 : f32 to vector<16x1xf32>
    %18 = arith.addf %14, %17 : vector<16x1xf32>
    %19 = math.rsqrt %18 : vector<16x1xf32>
    %20 = vector.broadcast %19 : vector<16x1xf32> to vector<16x32xf32>
    %21 = arith.mulf %16, %20 : vector<16x32xf32>
    %22 = vector.broadcast %2 : vector<1x32xf32> to vector<16x32xf32>
    %23 = arith.mulf %21, %22 : vector<16x32xf32>
    %24 = vector.broadcast %3 : vector<1x32xf32> to vector<16x32xf32>
    %25 = arith.addf %23, %24 : vector<16x32xf32>
    %c0_10 = arith.constant 0 : index
    %c0_11 = arith.constant 0 : index
    %26 = vector.load %arg2[%c0_10, %c0_11] : memref<32x96xf32, #tpu.memory_space<vmem>>, vector<32x96xf32>
    %cst_12 = arith.constant dense<0.000000e+00> : vector<16x96xf32>
    %27 = tpu.matmul %25, %26, %cst_12 {dimension_numbers = #tpu.dot_dimension_numbers<[1], [0], [0], [1], [0, 0, 1, 1], [], []>} : vector<16x32xf32>, vector<32x96xf32>, vector<16x96xf32> -> vector<16x96xf32>
    %c0_13 = arith.constant 0 : index
    %c0_14 = arith.constant 0 : index
    %28 = vector.load %arg3[%c0_13, %c0_14] : memref<1x96xf32, #tpu.memory_space<vmem>>, vector<1x96xf32>
    %29 = vector.broadcast %28 : vector<1x96xf32> to vector<16x96xf32>
    %30 = arith.addf %27, %29 : vector<16x96xf32>
    %31 = vector.extract_strided_slice %30 {offsets = [0, 0], sizes = [16, 32], strides = [1, 1]} : vector<16x96xf32> to vector<16x32xf32>
    %cst_15 = arith.constant 0.353553385 : f32
    %32 = vector.broadcast %cst_15 : f32 to vector<16x32xf32>
    %33 = arith.mulf %31, %32 : vector<16x32xf32>
    %34 = vector.extract_strided_slice %30 {offsets = [0, 32], sizes = [16, 32], strides = [1, 1]} : vector<16x96xf32> to vector<16x32xf32>
    %35 = vector.extract_strided_slice %30 {offsets = [0, 64], sizes = [16, 32], strides = [1, 1]} : vector<16x96xf32> to vector<16x32xf32>
    %c0_16 = arith.constant 0 : index
    %c0_17 = arith.constant 0 : index
    %36 = vector.load %arg4[%c0_16, %c0_17] : memref<32x32xf32, #tpu.memory_space<vmem>>, vector<32x32xf32>
    %cst_18 = arith.constant 0.000000e+00 : f32
    %37 = vector.broadcast %cst_18 : f32 to vector<16x32xf32>
    %38 = vector.extract_strided_slice %33 {offsets = [0, 0], sizes = [16, 8], strides = [1, 1]} : vector<16x32xf32> to vector<16x8xf32>
    %39 = vector.shape_cast %38 : vector<16x8xf32> to vector<2x8x8xf32>
    %40 = vector.extract_strided_slice %34 {offsets = [0, 0], sizes = [16, 8], strides = [1, 1]} : vector<16x32xf32> to vector<16x8xf32>
    %41 = vector.shape_cast %40 : vector<16x8xf32> to vector<2x8x8xf32>
    %42 = vector.extract_strided_slice %35 {offsets = [0, 0], sizes = [16, 8], strides = [1, 1]} : vector<16x32xf32> to vector<16x8xf32>
    %43 = vector.shape_cast %42 : vector<16x8xf32> to vector<2x8x8xf32>
    "tpu.trace_start"() <{level = 10 : i32, message = "bld,bmd->blm"}> : () -> ()
    %cst_19 = arith.constant dense<0.000000e+00> : vector<2x8x8xf32>
    %44 = tpu.matmul %39, %41, %cst_19 {dimension_numbers = #tpu.dot_dimension_numbers<[2], [2], [1], [1], [0, 0, 0, 1, 1, 1], [0], [0]>} : vector<2x8x8xf32>, vector<2x8x8xf32>, vector<2x8x8xf32> -> vector<2x8x8xf32>
    "tpu.trace_stop"() : () -> ()
    %cst_20 = arith.constant dense<0xFF800000> : vector<2x8xf32>
    %45 = vector.multi_reduction <maximumf>, %44, %cst_20 [2] : vector<2x8x8xf32> to vector<2x8xf32>
    %46 = vector.shape_cast %45 : vector<2x8xf32> to vector<2x8x1xf32>
    %47 = vector.broadcast %46 : vector<2x8x1xf32> to vector<2x8x8xf32>
    %48 = arith.subf %44, %47 : vector<2x8x8xf32>
    %49 = math.exp %48 : vector<2x8x8xf32>
    %cst_21 = arith.constant dense<0.000000e+00> : vector<2x8xf32>
    %50 = vector.multi_reduction <add>, %49, %cst_21 [2] : vector<2x8x8xf32> to vector<2x8xf32>
    %51 = vector.shape_cast %50 : vector<2x8xf32> to vector<2x8x1xf32>
    %52 = tpu.reciprocal %51 {approx = true} : vector<2x8x1xf32> -> vector<2x8x1xf32>
    %53 = vector.broadcast %52 : vector<2x8x1xf32> to vector<2x8x8xf32>
    %54 = arith.mulf %49, %53 : vector<2x8x8xf32>
    "tpu.trace_start"() <{level = 10 : i32, message = "blm,bmd->bld"}> : () -> ()
    %cst_22 = arith.constant dense<0.000000e+00> : vector<2x8x8xf32>
    %55 = tpu.matmul %54, %43, %cst_22 {dimension_numbers = #tpu.dot_dimension_numbers<[2], [1], [1], [2], [0, 0, 0, 1, 1, 2], [0], [0]>} : vector<2x8x8xf32>, vector<2x8x8xf32>, vector<2x8x8xf32> -> vector<2x8x8xf32>
    "tpu.trace_stop"() : () -> ()
    %56 = vector.shape_cast %55 : vector<2x8x8xf32> to vector<16x8xf32>
    %57 = vector.extract_strided_slice %36 {offsets = [0, 0], sizes = [8, 32], strides = [1, 1]} : vector<32x32xf32> to vector<8x32xf32>
    %cst_23 = arith.constant dense<0.000000e+00> : vector<16x32xf32>
    %58 = tpu.matmul %56, %57, %cst_23 {dimension_numbers = #tpu.dot_dimension_numbers<[1], [0], [0], [1], [0, 0, 1, 1], [], []>} : vector<16x8xf32>, vector<8x32xf32>, vector<16x32xf32> -> vector<16x32xf32>
    %59 = arith.addf %37, %58 : vector<16x32xf32>
    %60 = vector.extract_strided_slice %33 {offsets = [0, 8], sizes = [16, 8], strides = [1, 1]} : vector<16x32xf32> to vector<16x8xf32>
    %61 = vector.shape_cast %60 : vector<16x8xf32> to vector<2x8x8xf32>
    %62 = vector.extract_strided_slice %34 {offsets = [0, 8], sizes = [16, 8], strides = [1, 1]} : vector<16x32xf32> to vector<16x8xf32>
    %63 = vector.shape_cast %62 : vector<16x8xf32> to vector<2x8x8xf32>
    %64 = vector.extract_strided_slice %35 {offsets = [0, 8], sizes = [16, 8], strides = [1, 1]} : vector<16x32xf32> to vector<16x8xf32>
    %65 = vector.shape_cast %64 : vector<16x8xf32> to vector<2x8x8xf32>
    "tpu.trace_start"() <{level = 10 : i32, message = "bld,bmd->blm"}> : () -> ()
    %cst_24 = arith.constant dense<0.000000e+00> : vector<2x8x8xf32>
    %66 = tpu.matmul %61, %63, %cst_24 {dimension_numbers = #tpu.dot_dimension_numbers<[2], [2], [1], [1], [0, 0, 0, 1, 1, 1], [0], [0]>} : vector<2x8x8xf32>, vector<2x8x8xf32>, vector<2x8x8xf32> -> vector<2x8x8xf32>
    "tpu.trace_stop"() : () -> ()
    %cst_25 = arith.constant dense<0xFF800000> : vector<2x8xf32>
    %67 = vector.multi_reduction <maximumf>, %66, %cst_25 [2] : vector<2x8x8xf32> to vector<2x8xf32>
    %68 = vector.shape_cast %67 : vector<2x8xf32> to vector<2x8x1xf32>
    %69 = vector.broadcast %68 : vector<2x8x1xf32> to vector<2x8x8xf32>
    %70 = arith.subf %66, %69 : vector<2x8x8xf32>
    %71 = math.exp %70 : vector<2x8x8xf32>
    %cst_26 = arith.constant dense<0.000000e+00> : vector<2x8xf32>
    %72 = vector.multi_reduction <add>, %71, %cst_26 [2] : vector<2x8x8xf32> to vector<2x8xf32>
    %73 = vector.shape_cast %72 : vector<2x8xf32> to vector<2x8x1xf32>
    %74 = tpu.reciprocal %73 {approx = true} : vector<2x8x1xf32> -> vector<2x8x1xf32>
    %75 = vector.broadcast %74 : vector<2x8x1xf32> to vector<2x8x8xf32>
    %76 = arith.mulf %71, %75 : vector<2x8x8xf32>
    "tpu.trace_start"() <{level = 10 : i32, message = "blm,bmd->bld"}> : () -> ()
    %cst_27 = arith.constant dense<0.000000e+00> : vector<2x8x8xf32>
    %77 = tpu.matmul %76, %65, %cst_27 {dimension_numbers = #tpu.dot_dimension_numbers<[2], [1], [1], [2], [0, 0, 0, 1, 1, 2], [0], [0]>} : vector<2x8x8xf32>, vector<2x8x8xf32>, vector<2x8x8xf32> -> vector<2x8x8xf32>
    "tpu.trace_stop"() : () -> ()
    %78 = vector.shape_cast %77 : vector<2x8x8xf32> to vector<16x8xf32>
    %79 = vector.extract_strided_slice %36 {offsets = [8, 0], sizes = [8, 32], strides = [1, 1]} : vector<32x32xf32> to vector<8x32xf32>
    %cst_28 = arith.constant dense<0.000000e+00> : vector<16x32xf32>
    %80 = tpu.matmul %78, %79, %cst_28 {dimension_numbers = #tpu.dot_dimension_numbers<[1], [0], [0], [1], [0, 0, 1, 1], [], []>} : vector<16x8xf32>, vector<8x32xf32>, vector<16x32xf32> -> vector<16x32xf32>
    %81 = arith.addf %59, %80 : vector<16x32xf32>
    %82 = vector.extract_strided_slice %33 {offsets = [0, 16], sizes = [16, 8], strides = [1, 1]} : vector<16x32xf32> to vector<16x8xf32>
    %83 = vector.shape_cast %82 : vector<16x8xf32> to vector<2x8x8xf32>
    %84 = vector.extract_strided_slice %34 {offsets = [0, 16], sizes = [16, 8], strides = [1, 1]} : vector<16x32xf32> to vector<16x8xf32>
    %85 = vector.shape_cast %84 : vector<16x8xf32> to vector<2x8x8xf32>
    %86 = vector.extract_strided_slice %35 {offsets = [0, 16], sizes = [16, 8], strides = [1, 1]} : vector<16x32xf32> to vector<16x8xf32>
    %87 = vector.shape_cast %86 : vector<16x8xf32> to vector<2x8x8xf32>
    "tpu.trace_start"() <{level = 10 : i32, message = "bld,bmd->blm"}> : () -> ()
    %cst_29 = arith.constant dense<0.000000e+00> : vector<2x8x8xf32>
    %88 = tpu.matmul %83, %85, %cst_29 {dimension_numbers = #tpu.dot_dimension_numbers<[2], [2], [1], [1], [0, 0, 0, 1, 1, 1], [0], [0]>} : vector<2x8x8xf32>, vector<2x8x8xf32>, vector<2x8x8xf32> -> vector<2x8x8xf32>
    "tpu.trace_stop"() : () -> ()
    %cst_30 = arith.constant dense<0xFF800000> : vector<2x8xf32>
    %89 = vector.multi_reduction <maximumf>, %88, %cst_30 [2] : vector<2x8x8xf32> to vector<2x8xf32>
    %90 = vector.shape_cast %89 : vector<2x8xf32> to vector<2x8x1xf32>
    %91 = vector.broadcast %90 : vector<2x8x1xf32> to vector<2x8x8xf32>
    %92 = arith.subf %88, %91 : vector<2x8x8xf32>
    %93 = math.exp %92 : vector<2x8x8xf32>
    %cst_31 = arith.constant dense<0.000000e+00> : vector<2x8xf32>
    %94 = vector.multi_reduction <add>, %93, %cst_31 [2] : vector<2x8x8xf32> to vector<2x8xf32>
    %95 = vector.shape_cast %94 : vector<2x8xf32> to vector<2x8x1xf32>
    %96 = tpu.reciprocal %95 {approx = true} : vector<2x8x1xf32> -> vector<2x8x1xf32>
    %97 = vector.broadcast %96 : vector<2x8x1xf32> to vector<2x8x8xf32>
    %98 = arith.mulf %93, %97 : vector<2x8x8xf32>
    "tpu.trace_start"() <{level = 10 : i32, message = "blm,bmd->bld"}> : () -> ()
    %cst_32 = arith.constant dense<0.000000e+00> : vector<2x8x8xf32>
    %99 = tpu.matmul %98, %87, %cst_32 {dimension_numbers = #tpu.dot_dimension_numbers<[2], [1], [1], [2], [0, 0, 0, 1, 1, 2], [0], [0]>} : vector<2x8x8xf32>, vector<2x8x8xf32>, vector<2x8x8xf32> -> vector<2x8x8xf32>
    "tpu.trace_stop"() : () -> ()
    %100 = vector.shape_cast %99 : vector<2x8x8xf32> to vector<16x8xf32>
    %101 = vector.extract_strided_slice %36 {offsets = [16, 0], sizes = [8, 32], strides = [1, 1]} : vector<32x32xf32> to vector<8x32xf32>
    %cst_33 = arith.constant dense<0.000000e+00> : vector<16x32xf32>
    %102 = tpu.matmul %100, %101, %cst_33 {dimension_numbers = #tpu.dot_dimension_numbers<[1], [0], [0], [1], [0, 0, 1, 1], [], []>} : vector<16x8xf32>, vector<8x32xf32>, vector<16x32xf32> -> vector<16x32xf32>
    %103 = arith.addf %81, %102 : vector<16x32xf32>
    %104 = vector.extract_strided_slice %33 {offsets = [0, 24], sizes = [16, 8], strides = [1, 1]} : vector<16x32xf32> to vector<16x8xf32>
    %105 = vector.shape_cast %104 : vector<16x8xf32> to vector<2x8x8xf32>
    %106 = vector.extract_strided_slice %34 {offsets = [0, 24], sizes = [16, 8], strides = [1, 1]} : vector<16x32xf32> to vector<16x8xf32>
    %107 = vector.shape_cast %106 : vector<16x8xf32> to vector<2x8x8xf32>
    %108 = vector.extract_strided_slice %35 {offsets = [0, 24], sizes = [16, 8], strides = [1, 1]} : vector<16x32xf32> to vector<16x8xf32>
    %109 = vector.shape_cast %108 : vector<16x8xf32> to vector<2x8x8xf32>
    "tpu.trace_start"() <{level = 10 : i32, message = "bld,bmd->blm"}> : () -> ()
    %cst_34 = arith.constant dense<0.000000e+00> : vector<2x8x8xf32>
    %110 = tpu.matmul %105, %107, %cst_34 {dimension_numbers = #tpu.dot_dimension_numbers<[2], [2], [1], [1], [0, 0, 0, 1, 1, 1], [0], [0]>} : vector<2x8x8xf32>, vector<2x8x8xf32>, vector<2x8x8xf32> -> vector<2x8x8xf32>
    "tpu.trace_stop"() : () -> ()
    %cst_35 = arith.constant dense<0xFF800000> : vector<2x8xf32>
    %111 = vector.multi_reduction <maximumf>, %110, %cst_35 [2] : vector<2x8x8xf32> to vector<2x8xf32>
    %112 = vector.shape_cast %111 : vector<2x8xf32> to vector<2x8x1xf32>
    %113 = vector.broadcast %112 : vector<2x8x1xf32> to vector<2x8x8xf32>
    %114 = arith.subf %110, %113 : vector<2x8x8xf32>
    %115 = math.exp %114 : vector<2x8x8xf32>
    %cst_36 = arith.constant dense<0.000000e+00> : vector<2x8xf32>
    %116 = vector.multi_reduction <add>, %115, %cst_36 [2] : vector<2x8x8xf32> to vector<2x8xf32>
    %117 = vector.shape_cast %116 : vector<2x8xf32> to vector<2x8x1xf32>
    %118 = tpu.reciprocal %117 {approx = true} : vector<2x8x1xf32> -> vector<2x8x1xf32>
    %119 = vector.broadcast %118 : vector<2x8x1xf32> to vector<2x8x8xf32>
    %120 = arith.mulf %115, %119 : vector<2x8x8xf32>
    "tpu.trace_start"() <{level = 10 : i32, message = "blm,bmd->bld"}> : () -> ()
    %cst_37 = arith.constant dense<0.000000e+00> : vector<2x8x8xf32>
    %121 = tpu.matmul %120, %109, %cst_37 {dimension_numbers = #tpu.dot_dimension_numbers<[2], [1], [1], [2], [0, 0, 0, 1, 1, 2], [0], [0]>} : vector<2x8x8xf32>, vector<2x8x8xf32>, vector<2x8x8xf32> -> vector<2x8x8xf32>
    "tpu.trace_stop"() : () -> ()
    %122 = vector.shape_cast %121 : vector<2x8x8xf32> to vector<16x8xf32>
    %123 = vector.extract_strided_slice %36 {offsets = [24, 0], sizes = [8, 32], strides = [1, 1]} : vector<32x32xf32> to vector<8x32xf32>
    %cst_38 = arith.constant dense<0.000000e+00> : vector<16x32xf32>
    %124 = tpu.matmul %122, %123, %cst_38 {dimension_numbers = #tpu.dot_dimension_numbers<[1], [0], [0], [1], [0, 0, 1, 1], [], []>} : vector<16x8xf32>, vector<8x32xf32>, vector<16x32xf32> -> vector<16x32xf32>
    %125 = arith.addf %103, %124 : vector<16x32xf32>
    %126 = arith.addf %1, %125 : vector<16x32xf32>
    %c0_39 = arith.constant 0 : index
    %c0_40 = arith.constant 0 : index
    %127 = vector.load %arg5[%c0_39, %c0_40] : memref<1x32xf32, #tpu.memory_space<vmem>>, vector<1x32xf32>
    %128 = vector.broadcast %127 : vector<1x32xf32> to vector<16x32xf32>
    %129 = arith.addf %126, %128 : vector<16x32xf32>
    %c0_41 = arith.constant 0 : index
    %c0_42 = arith.constant 0 : index
    %130 = vector.load %arg8[%c0_41, %c0_42] : memref<1x32xf32, #tpu.memory_space<vmem>>, vector<1x32xf32>
    %c0_43 = arith.constant 0 : index
    %c0_44 = arith.constant 0 : index
    %131 = vector.load %arg9[%c0_43, %c0_44] : memref<1x32xf32, #tpu.memory_space<vmem>>, vector<1x32xf32>
    %cst_45 = arith.constant dense<0.000000e+00> : vector<16xf32>
    %132 = vector.multi_reduction <add>, %129, %cst_45 [1] : vector<16x32xf32> to vector<16xf32>
    %133 = vector.shape_cast %132 : vector<16xf32> to vector<16x1xf32>
    %cst_46 = arith.constant 3.200000e+01 : f32
    %134 = vector.broadcast %cst_46 : f32 to vector<16x1xf32>
    %135 = arith.divf %133, %134 : vector<16x1xf32>
    %136 = vector.broadcast %135 : vector<16x1xf32> to vector<16x32xf32>
    %137 = arith.subf %129, %136 : vector<16x32xf32>
    %138 = arith.mulf %137, %137 : vector<16x32xf32>
    %cst_47 = arith.constant dense<0.000000e+00> : vector<16xf32>
    %139 = vector.multi_reduction <add>, %138, %cst_47 [1] : vector<16x32xf32> to vector<16xf32>
    %140 = vector.shape_cast %139 : vector<16xf32> to vector<16x1xf32>
    %cst_48 = arith.constant 3.200000e+01 : f32
    %141 = vector.broadcast %cst_48 : f32 to vector<16x1xf32>
    %142 = arith.divf %140, %141 : vector<16x1xf32>
    %143 = vector.broadcast %135 : vector<16x1xf32> to vector<16x32xf32>
    %144 = arith.subf %129, %143 : vector<16x32xf32>
    %cst_49 = arith.constant 9.99999974E-6 : f32
    %145 = vector.broadcast %cst_49 : f32 to vector<16x1xf32>
    %146 = arith.addf %142, %145 : vector<16x1xf32>
    %147 = math.rsqrt %146 : vector<16x1xf32>
    %148 = vector.broadcast %147 : vector<16x1xf32> to vector<16x32xf32>
    %149 = arith.mulf %144, %148 : vector<16x32xf32>
    %150 = vector.broadcast %130 : vector<1x32xf32> to vector<16x32xf32>
    %151 = arith.mulf %149, %150 : vector<16x32xf32>
    %152 = vector.broadcast %131 : vector<1x32xf32> to vector<16x32xf32>
    %153 = arith.addf %151, %152 : vector<16x32xf32>
    %c0_50 = arith.constant 0 : index
    %c0_51 = arith.constant 0 : index
    %154 = vector.load %arg10[%c0_50, %c0_51] : memref<32x128xf32, #tpu.memory_space<vmem>>, vector<32x128xf32>
    %cst_52 = arith.constant dense<0.000000e+00> : vector<16x128xf32>
    %155 = tpu.matmul %153, %154, %cst_52 {dimension_numbers = #tpu.dot_dimension_numbers<[1], [0], [0], [1], [0, 0, 1, 1], [], []>} : vector<16x32xf32>, vector<32x128xf32>, vector<16x128xf32> -> vector<16x128xf32>
    %c0_53 = arith.constant 0 : index
    %c0_54 = arith.constant 0 : index
    %156 = vector.load %arg11[%c0_53, %c0_54] : memref<1x128xf32, #tpu.memory_space<vmem>>, vector<1x128xf32>
    %157 = vector.broadcast %156 : vector<1x128xf32> to vector<16x128xf32>
    %158 = arith.addf %155, %157 : vector<16x128xf32>
    %cst_55 = arith.constant 1.702000e+00 : f32
    %159 = vector.broadcast %cst_55 : f32 to vector<16x128xf32>
    %160 = arith.mulf %159, %158 : vector<16x128xf32>
    %161 = arith.negf %160 : vector<16x128xf32>
    %162 = math.exp %161 : vector<16x128xf32>
    %cst_56 = arith.constant 1.000000e+00 : f32
    %163 = vector.broadcast %cst_56 : f32 to vector<16x128xf32>
    %164 = arith.addf %163, %162 : vector<16x128xf32>
    %165 = arith.divf %163, %164 : vector<16x128xf32>
    %166 = arith.mulf %158, %165 : vector<16x128xf32>
    %c0_57 = arith.constant 0 : index
    %c0_58 = arith.constant 0 : index
    %167 = vector.load %arg12[%c0_57, %c0_58] : memref<128x32xf32, #tpu.memory_space<vmem>>, vector<128x32xf32>
    %cst_59 = arith.constant dense<0.000000e+00> : vector<16x32xf32>
    %168 = tpu.matmul %166, %167, %cst_59 {dimension_numbers = #tpu.dot_dimension_numbers<[1], [0], [0], [1], [0, 0, 1, 1], [], []>} : vector<16x128xf32>, vector<128x32xf32>, vector<16x32xf32> -> vector<16x32xf32>
    %c0_60 = arith.constant 0 : index
    %c0_61 = arith.constant 0 : index
    %169 = vector.load %arg13[%c0_60, %c0_61] : memref<1x32xf32, #tpu.memory_space<vmem>>, vector<1x32xf32>
    %170 = vector.broadcast %169 : vector<1x32xf32> to vector<16x32xf32>
    %171 = arith.addf %168, %170 : vector<16x32xf32>
    %172 = arith.addf %129, %171 : vector<16x32xf32>
    %173 = vector.shape_cast %172 : vector<16x32xf32> to vector<2x8x32xf32>
    %c0_62 = arith.constant 0 : index
    %c0_63 = arith.constant 0 : index
    %c0_64 = arith.constant 0 : index
    %174 = vector.load %arg14[%c0_62, %c0_63, %c0_64] : memref<2x8x32xf32, #tpu.memory_space<vmem>>, vector<2x8x32xf32>
    tpu.vector_store %arg14[%c0_62, %c0_63, %c0_64], %173 {strides = array<i32>} : memref<2x8x32xf32, #tpu.memory_space<vmem>>, vector<2x8x32xf32>,
    return
  }
  func.func @transform_0(%arg0: i32) -> (i32, i32, i32) {
    %c0_i32 = arith.constant 0 : i32
    %c0_i32_0 = arith.constant 0 : i32
    %c0_i32_1 = arith.constant 0 : i32
    return %arg0, %c0_i32, %c0_i32_0 : i32, i32, i32
  }
  func.func @transform_1(%arg0: i32) -> (i32, i32) {
    %c0_i32 = arith.constant 0 : i32
    %c0_i32_0 = arith.constant 0 : i32
    %c0_i32_1 = arith.constant 0 : i32
    return %c0_i32, %c0_i32_0 : i32, i32
  }
  func.func @transform_2(%arg0: i32) -> (i32, i32) {
    %c0_i32 = arith.constant 0 : i32
    %c0_i32_0 = arith.constant 0 : i32
    %c0_i32_1 = arith.constant 0 : i32
    return %c0_i32, %c0_i32_0 : i32, i32
  }
  func.func @transform_3(%arg0: i32) -> (i32, i32) {
    %c0_i32 = arith.constant 0 : i32
    %c0_i32_0 = arith.constant 0 : i32
    %c0_i32_1 = arith.constant 0 : i32
    return %c0_i32, %c0_i32_0 : i32, i32
  }
  func.func @transform_4(%arg0: i32) -> (i32, i32) {
    %c0_i32 = arith.constant 0 : i32
    %c0_i32_0 = arith.constant 0 : i32
    %c0_i32_1 = arith.constant 0 : i32
    return %c0_i32, %c0_i32_0 : i32, i32
  }
  func.func @transform_5(%arg0: i32) -> (i32, i32) {
    %c0_i32 = arith.constant 0 : i32
    %c0_i32_0 = arith.constant 0 : i32
    %c0_i32_1 = arith.constant 0 : i32
    return %c0_i32, %c0_i32_0 : i32, i32
  }
  func.func @transform_6(%arg0: i32) -> (i32, i32) {
    %c0_i32 = arith.constant 0 : i32
    %c0_i32_0 = arith.constant 0 : i32
    %c0_i32_1 = arith.constant 0 : i32
    return %c0_i32, %c0_i32_0 : i32, i32
  }
  func.func @transform_7(%arg0: i32) -> (i32, i32) {
    %c0_i32 = arith.constant 0 : i32
    %c0_i32_0 = arith.constant 0 : i32
    %c0_i32_1 = arith.constant 0 : i32
    return %c0_i32, %c0_i32_0 : i32, i32
  }
  func.func @transform_8(%arg0: i32) -> (i32, i32) {
    %c0_i32 = arith.constant 0 : i32
    %c0_i32_0 = arith.constant 0 : i32
    %c0_i32_1 = arith.constant 0 : i32
    return %c0_i32, %c0_i32_0 : i32, i32
  }
  func.func @transform_9(%arg0: i32) -> (i32, i32) {
    %c0_i32 = arith.constant 0 : i32
    %c0_i32_0 = arith.constant 0 : i32
    %c0_i32_1 = arith.constant 0 : i32
    return %c0_i32, %c0_i32_0 : i32, i32
  }
  func.func @transform_10(%arg0: i32) -> (i32, i32) {
    %c0_i32 = arith.constant 0 : i32
    %c0_i32_0 = arith.constant 0 : i32
    %c0_i32_1 = arith.constant 0 : i32
    return %c0_i32, %c0_i32_0 : i32, i32
  }
  func.func @transform_11(%arg0: i32) -> (i32, i32) {
    %c0_i32 = arith.constant 0 : i32
    %c0_i32_0 = arith.constant 0 : i32
    %c0_i32_1 = arith.constant 0 : i32
    return %c0_i32, %c0_i32_0 : i32, i32
  }
  func.func @transform_12(%arg0: i32) -> (i32, i32) {
    %c0_i32 = arith.constant 0 : i32
    %c0_i32_0 = arith.constant 0 : i32
    %c0_i32_1 = arith.constant 0 : i32
    return %c0_i32, %c0_i32_0 : i32, i32
  }
  func.func @transform_13(%arg0: i32) -> (i32, i32, i32) {
    %c0_i32 = arith.constant 0 : i32
    %c0_i32_0 = arith.constant 0 : i32
    %c0_i32_1 = arith.constant 0 : i32
    return %arg0, %c0_i32, %c0_i32_0 : i32, i32, i32
  }
}

</mosaic_0001>

<bundles_post_ra>
// kernel: tpu_custom_call.1
= control target key start
LH: loop header
LB: loop body
LE: loop exit
PB: predicated region body
PF: predicated region fallthrough
CT: control target
= control target key end

     0   :  { %vm49_vm0 = vcmask 261120   ;;  %s2930_s0 = inlined_call_operand.vmem [shape: f32[2,8,32], index: 0, kind: input, shape index: {}]   ;;  %s2931_s1 = inlined_call_operand.vmem [shape: f32[32,96], index: 1, kind: input, shape index: {}]   ;;  %s2932_s2 = inlined_call_operand.vmem [shape: f32[1,96], index: 2, kind: input, shape index: {}]   ;;  %s2933_s3 = inlined_call_operand.vmem [shape: f32[32,32], index: 3, kind: input, shape index: {}]   ;;  %s2934_s4 = inlined_call_operand.vmem [shape: f32[1,32], index: 4, kind: input, shape index: {}]   ;;  %s2935_s5 = inlined_call_operand.vmem [shape: f32[1,32], index: 5, kind: input, shape index: {}]   ;;  %s2936_s6 = inlined_call_operand.vmem [shape: f32[1,32], index: 6, kind: input, shape index: {}]   ;;  %s2937_s7 = inlined_call_operand.vmem [shape: f32[1,32], index: 7, kind: input, shape index: {}]   ;;  %s2938_s8 = inlined_call_operand.vmem [shape: f32[1,32], index: 8, kind: input, shape index: {}]   ;;  %s2939_s9 = inlined_call_operand.vmem [shape: f32[32,128], index: 9, kind: input, shape index: {}]   ;;  %s2940_s10 = inlined_call_operand.vmem [shape: f32[1,128], index: 10, kind: input, shape index: {}]   ;;  %s2941_s11 = inlined_call_operand.vmem [shape: f32[128,32], index: 11, kind: input, shape index: {}]   ;;  %s2942_s12 = inlined_call_operand.vmem [shape: f32[1,32], index: 12, kind: input, shape index: {}]   ;;  %s2943_s13 = inlined_call_operand.hbm [shape: f32[2,8,32], index: 13, kind: output, shape index: {}]  }
   0x1   :  { %v2629_v0 = vld [vmem:[%s2930_s0] sm:$0xff]  ;;  %v2634_v1 = vld [vmem:[%s2930_s0 + $0x8] sm:$0xff] }
   0x2   :  { %18 = vsyncpa [#allocation3], 0  ;;  %v50_v2 = vsel %vm49_vm0, %v2629_v0, 0.0  ;;  %v53_v3 = vsel %vm49_vm0, %v2634_v1, 0.0  ;;  %v93_v14 = vld [vmem:[%s2931_s1] sm:$0xff]  ;;  %v94_v15 = vld [vmem:[%s2931_s1 + $0x8] sm:$0xff] }
   0x3   :  { %51 = vadd.xlane.f32.xlu0 %v50_v2  ;;  %v95_v16 = vld [vmem:[%s2931_s1 + $0x10] sm:$0xff]  ;;  %v2398_v17 = vpack.c.bf16 %v94_v15, %v93_v14  ;;  %v96_v18 = vld [vmem:[%s2931_s1 + $0x18] sm:$0xff]  ;;  %v2121_v27 = vld [vmem:[%s2935_s5] ss:$0 sm:$0xff]  ;;  %v2540_v36 = vmov 0.0   ;;  %vm2541_vm1 = vmmov 0  }
   0x4   :  { %v2402_v19 = vpack.c.bf16 %v96_v18, %v95_v16  ;;  %v2122_v29 = vld [vmem:[%s2936_s6] ss:$0 sm:$0xff]  ;;  %2282 = vmatprep.subr.mxu0 %v2540_v36  ;;  %2284 = vmatprep.mubr.msk.f32.mxu0 %vm2541_vm1, %v2540_v36  ;;  %s2542_s22 = smov 96   ;;  %vm194_vm2 = vcmask 64512   ;;  %s2544_s23 = smov 88  }
   0x5   :  { %2399 = vmatprep.subr.bf16.mxu1 %v2398_v17  ;;  %v2123_v37 = vld [vmem:[%s2932_s2] ss:$0 sm:$0xff]  ;;  %s2543_s2 = smov 64   ;;  %s2545_s24 = smov 120  }
   0x6   :  { %2401 = vmatpush3.bf16.msra.mxu1 %v2398_v17  ;;  %s2546_s25 = smov 80   ;;  %s2547_s26 = smov 56  }
   0x7   :  { %54 = vadd.xlane.f32.xlu0 %v53_v3  ;;  %2403 = vmatprep.subr.bf16.mxu1 %v2402_v19  ;;  %s2548_s27 = smov 112   ;;  %s2549_s28 = smov 48  }
   0x8   :  { %s2550_s0 = smov 72   ;;  %s2551_s29 = smov 104  }
   0x9   :  { %s2552_s19 = smov 40   ;;  %s2553_s16 = smov [#allocation2]  }
   0xa   :  { %2405 = vmatpush3.bf16.msra.mxu1 %v2402_v19  ;;  %s2110_s17 = sshll.u32 %s2553_s16, 4  ;;  %s2111_s17 = int_to_ptr.vmem [resolvable:$true] %s2110_s17 }
   0xb   :  { %2252 = vmatprep.subr.mxu1 %v2540_v36  ;;  %s2516_s18 = scalar_lea.vmem %s2111_s17, 256  ;;  %p2521_p1 = scmp.lt.s32.totalorder %s2111_s17, %s2111_s17 }
   0xc   :  { %p2517_p0 = scmp.ne.s32.totalorder %s2111_s17, %s2516_s18  ;;  %p2522_p2 = scmp.lt.s32.totalorder %s2516_s18, %s2516_s18 }
   0xe   :  { %p2523_p3 = por %p2522_p2, %p2521_p1 }
  0x10   :  { %p2524_p4 = pnand %p2523_p3, %p2517_p0 }
  0x90   :  { %v52_v4 = vpop.xlane.xlu0 %51 }
  0x91   :  { %v57_v5 = vmul.f32 0.03125, %v52_v4 }
  0x93   :  { %v59_v6 = vsub.f32 %v2629_v0, %v57_v5 }
  0x94   :  { %v55_v7 = vpop.xlane.xlu0 %54 }
  0x95   :  { %v58_v8 = vmul.f32 0.03125, %v55_v7  ;;  %v61_v9 = vmul.f32 %v59_v6, %v59_v6 }
  0x97   :  { %v60_v10 = vsub.f32 %v2634_v1, %v58_v8  ;;  %v63_v11 = vsel %vm49_vm0, %v61_v9, 0.0 }
  0x98   :  { %64 = vadd.xlane.f32.xlu1 %v63_v11 }
  0x99   :  { %v62_v12 = vmul.f32 %v60_v10, %v60_v10 }
  0x9b   :  { %v66_v13 = vsel %vm49_vm0, %v62_v12, 0.0 }
  0x9c   :  { %67 = vadd.xlane.f32.xlu1 %v66_v13 }
 0x125   :  { %v65_v20 = vpop.xlane.xlu1 %64 }
 0x126   :  { %v69_v21 = vmul.f32 0.03125, %v65_v20 }
 0x128   :  { %v71_v22 = vadd.f32 1e-05, %v69_v21 }
 0x129   :  { %v68_v23 = vpop.xlane.xlu1 %67 }
 0x12a   :  { %2468 = vrsqrt.f32 %v71_v22  ;;  %v70_v24 = vmul.f32 0.03125, %v68_v23 }
 0x12c   :  { %v72_v25 = vadd.f32 1e-05, %v70_v24 }
 0x12e   :  { %2470 = vrsqrt.f32 %v72_v25 }
 0x134   :  { %v2469_v26 = vpop.eup %2468 }
 0x135   :  { %v75_v28 = vmul.f32 %v2469_v26, %v59_v6 }
 0x137   :  { %v83_v30 = vmul.f32 %v2121_v27, %v75_v28 }
 0x138   :  { %v2471_v31 = vpop.eup %2470 }
 0x139   :  { %v76_v32 = vmul.f32 %v2471_v31, %v60_v10  ;;  %v91_v33 = vadd.f32 %v2122_v29, %v83_v30 }
 0x13b   :  { %v84_v34 = vmul.f32 %v2121_v27, %v76_v32  ;;  %2249 = vmatprep.mubr.msk.f32.mxu1 %vm49_vm0, %v91_v33 }
 0x13d   :  { %v92_v35 = vadd.f32 %v2122_v29, %v84_v34 }
 0x13f   :  { %2250 = vmatmul.mubr.msk.f32.vlgmr.msra.gmra.mrb[0].mxu1 %vm49_vm0, %v92_v35 }
 0x140   :  { %2254 = vmatprep.mubr.msk.f32.mxu1 %vm2541_vm1, %v2540_v36 }
 0x212   :  { %v2251_v38 = vpop.f32.mrb[0].mxu1 }
 0x213   :  { %v2673_v39 = vadd.f32 %v2251_v38, %v2123_v37  ;;  %v176_v40 = vpop.f32.mrb[1].mxu1 }
 0x214   :  { %v2675_v41 = vadd.f32 %v2123_v37, %v176_v40 }
 0x215   :  { %271 = vrot.lane.b32.xlu1 %v2673_v39, %s2542_s22  ;;  %v2690_v45 = vmul.f32 0.35355338, %v2673_v39 }
 0x216   :  { %192 = vrot.lane.b32.xlu0 %v2675_v41, %s2542_s22  ;;  %v2681_v43 = vmul.f32 0.35355338, %v2675_v41 }
 0x287   :  { %v272_v44 = vpop.permute.xlu1 %271 }
 0x288   :  { %v193_v42 = vpop.permute.xlu0 %192 }
 0x289   :  { %2253 = vmatpush3.xpose.msk.msra.mxu1 %vm194_vm2, %v193_v42 }
 0x28a   :  { %2257 = vmatprep.subr.mxu1 %v2540_v36 }
 0x28c   :  { %2255 = vmatmul.mubr.msk.f32.vlgmr.msra.gmra.mrb[2].mxu1 %vm194_vm2, %v2681_v43 }
 0x28d   :  { %2258 = vmatpush3.xpose.msk.msra.mxu1 %vm194_vm2, %v272_v44  ;;  %2259 = vmatprep.mubr.msk.f32.mxu1 %vm2541_vm1, %v2540_v36 }
 0x28e   :  { %2262 = vmatprep.subr.mxu1 %v2540_v36 }
 0x290   :  { %2260 = vmatmul.mubr.msk.f32.vlgmr.msra.gmra.mrb[4].mxu1 %vm194_vm2, %v2690_v45 }
 0x291   :  { %2264 = vmatprep.mubr.msk.f32.mxu1 %vm2541_vm1, %v2540_v36 }
 0x35f   :  { %v266_v46 = vpop.f32.mrb[2].mxu1 }
 0x360   :  { %v2256_v47 = vpop.f32.mrb[3].mxu1  ;;  %v348_v48 = vsel %vm194_vm2, %v266_v46, -inf }
 0x361   :  { %349 = vmax.xlane.f32.xlu1 %v348_v48 }
 0x363   :  { %v344_v49 = vpop.f32.mrb[4].mxu1 }
 0x364   :  { %v2261_v50 = vpop.f32.mrb[5].mxu1  ;;  %v351_v51 = vsel %vm194_vm2, %v344_v49, -inf }
 0x365   :  { %352 = vmax.xlane.f32.xlu0 %v351_v51 }
 0x372   :  { %446 = vrot.lane.b32.xlu1 %v2673_v39, %s2543_s2 }
 0x376   :  { %524 = vrot.lane.b32.xlu1 %v2675_v41, %s2544_s23 }
 0x37a   :  { %522 = vrot.lane.b32.xlu1 %v2681_v43, %s2545_s24 }
 0x3ee   :  { %v350_v52 = vpop.xlane.xlu1 %349 }
 0x3ef   :  { %v354_v53 = vsub.f32 %v266_v46, %v350_v52 }
 0x3f1   :  { %v356_v54 = vmul.f32 1.442695, %v354_v53 }
 0x3f2   :  { %v353_v55 = vpop.xlane.xlu0 %352  ;;  %v447_v62 = vpop.permute.xlu1 %446 }
 0x3f3   :  { %2472 = vpow2.f32 %v356_v54  ;;  %v355_v56 = vsub.f32 %v344_v49, %v353_v55 }
 0x3f5   :  { %v358_v57 = vmul.f32 1.442695, %v355_v56 }
 0x3f6   :  { %v525_v63 = vpop.permute.xlu1 %524 }
 0x3f7   :  { %2474 = vpow2.f32 %v358_v57  ;;  %v188_v57 = vld [vmem:[%s2933_s3 + $0x8] sm:$0xff] }
 0x3fa   :  { %v523_v2 = vpop.permute.xlu1 %522 }
 0x3fd   :  { %v2473_v58 = vpop.eup %2472 }
 0x3fe   :  { %v360_v59 = vsel %vm194_vm2, %v2473_v58, 0.0 }
 0x3ff   :  { %361 = vadd.xlane.f32.xlu0 %v360_v59 }
 0x401   :  { %v2475_v60 = vpop.eup %2474 }
 0x402   :  { %v363_v61 = vsel %vm194_vm2, %v2475_v60, 0.0 }
 0x403   :  { %364 = vadd.xlane.f32.xlu1 %v363_v61 }
 0x414   :  { %600 = vrot.lane.b32.xlu1 %v2690_v45, %s2545_s24 }
 0x415   :  { %370 = vrot.lane.b32.xlu0 %v2675_v41, %s2543_s2 }
 0x418   :  { %1016 = vrot.lane.b32.xlu1 %v2675_v41, %s2546_s25 }
 0x419   :  { %602 = vrot.lane.b32.xlu0 %v2673_v39, %s2544_s23 }
 0x48c   :  { %v362_v3 = vpop.xlane.xlu0 %361 }
 0x48d   :  { %2476 = vrcp.f32 %v362_v3 }
 0x490   :  { %v365_v4 = vpop.xlane.xlu1 %364  ;;  %v371_v5 = vpop.permute.xlu0 %370 }
 0x491   :  { %2478 = vrcp.f32 %v365_v4  ;;  %2263 = vmatpush3.msra.mxu1 %v371_v5 }
 0x492   :  { %2267 = vmatprep.subr.mxu1 %v2540_v36 }
 0x494   :  { %v603_v10 = vpop.permute.xlu0 %602  ;;  %v601_v11 = vpop.permute.xlu1 %600 }
 0x497   :  { %v2477_v6 = vpop.eup %2476 }
 0x498   :  { %v368_v7 = vmul.f32 %v2477_v6, %v2473_v58  ;;  %v1017_v28 = vpop.permute.xlu1 %1016  ;;  %v187_v58 = vld [vmem:[%s2933_s3] sm:$0xff] }
 0x49a   :  { %2265 = vmatmul.mubr.msk.f32.vlgmr.msra.gmra.mrb[6].mxu1 %vm194_vm2, %v368_v7 }
 0x49b   :  { %v2479_v8 = vpop.eup %2478  ;;  %2268 = vmatpush3.msra.mxu1 %v447_v62  ;;  %2269 = vmatprep.mubr.msk.f32.mxu1 %vm2541_vm1, %v2540_v36 }
 0x49c   :  { %v369_v9 = vmul.f32 %v2479_v8, %v2475_v60  ;;  %2272 = vmatprep.subr.mxu1 %v2540_v36 }
 0x49e   :  { %2270 = vmatmul.mubr.msk.f32.vlgmr.msra.gmra.mrb[8].mxu1 %vm194_vm2, %v369_v9 }
 0x49f   :  { %2274 = vmatprep.mubr.msk.f32.mxu1 %vm2541_vm1, %v2540_v36 }
 0x4a2   :  { %2273 = vmatpush3.xpose.msk.msra.mxu1 %vm194_vm2, %v525_v63 }
 0x4a3   :  { %2277 = vmatprep.subr.mxu1 %v2540_v36 }
 0x4a5   :  { %2275 = vmatmul.mubr.msk.f32.vlgmr.msra.gmra.mrb[10].mxu1 %vm194_vm2, %v523_v2 }
 0x4a6   :  { %2278 = vmatpush3.xpose.msk.msra.mxu1 %vm194_vm2, %v603_v10  ;;  %2279 = vmatprep.mubr.msk.f32.mxu1 %vm2541_vm1, %v2540_v36  ;;  %v189_v10 = vld [vmem:[%s2933_s3 + $0x10] sm:$0xff] }
 0x4a7   :  { %2287 = vmatprep.subr.mxu1 %v2540_v36 }
 0x4a9   :  { %2280 = vmatmul.mubr.msk.f32.vlgmr.msra.gmra.mrb[12].mxu1 %vm194_vm2, %v601_v11 }
 0x4aa   :  { %2289 = vmatprep.mubr.msk.f32.mxu1 %vm2541_vm1, %v2540_v36 }
 0x56d   :  { %v2727_v12 = vpop.f32.mrb[6].mxu1 }
 0x56e   :  { %v2266_v13 = vpop.f32.mrb[7].mxu1 }
 0x571   :  { %v2729_v14 = vpop.f32.mrb[8].mxu1 }
 0x572   :  { %v2271_v15 = vpop.f32.mrb[9].mxu1 }
 0x578   :  { %v596_v16 = vpop.f32.mrb[10].mxu1 }
 0x579   :  { %v2276_v17 = vpop.f32.mrb[11].mxu1  ;;  %v678_v27 = vsel %vm194_vm2, %v596_v16, -inf }
 0x57c   :  { %v674_v18 = vpop.f32.mrb[12].mxu1 }
 0x57d   :  { %v2281_v19 = vpop.f32.mrb[13].mxu1  ;;  %v681_v20 = vsel %vm194_vm2, %v674_v18, -inf }
 0x57e   :  { %682 = vmax.xlane.f32.xlu0 %v681_v20 }
 0x594   :  { %776 = vrot.lane.b32.xlu0 %v2673_v39, %s2547_s26 }
 0x598   :  { %1014 = vrot.lane.b32.xlu0 %v2681_v43, %s2548_s27 }
 0x59c   :  { %1092 = vrot.lane.b32.xlu0 %v2690_v45, %s2548_s27 }
 0x60b   :  { %v683_v21 = vpop.xlane.xlu0 %682 }
 0x60c   :  { %v685_v22 = vsub.f32 %v674_v18, %v683_v21 }
 0x60e   :  { %v688_v23 = vmul.f32 1.442695, %v685_v22 }
 0x60f   :  { %v777_v24 = vpop.permute.xlu0 %776 }
 0x610   :  { %2480 = vpow2.f32 %v688_v23  ;;  %2288 = vmatpush3.msra.mxu1 %v777_v24 }
 0x611   :  { %2302 = vmatprep.subr.mxu1 %v2540_v36 }
 0x613   :  { %v1015_v32 = vpop.permute.xlu0 %1014 }
 0x617   :  { %v1093_v34 = vpop.permute.xlu0 %1092 }
 0x61a   :  { %v2481_v25 = vpop.eup %2480 }
 0x61b   :  { %v693_v26 = vsel %vm194_vm2, %v2481_v25, 0.0 }
 0x61c   :  { %694 = vadd.xlane.f32.xlu1 %v693_v26 }
 0x62d   :  { %1094 = vrot.lane.b32.xlu1 %v2673_v39, %s2546_s25 }
 0x651   :  { %679 = vmax.xlane.f32.xlu1 %v678_v27 }
 0x6a9   :  { %v695_v29 = vpop.xlane.xlu1 %694 }
 0x6aa   :  { %2482 = vrcp.f32 %v695_v29 }
 0x6ad   :  { %v1095_v33 = vpop.permute.xlu1 %1094 }
 0x6b4   :  { %v2483_v30 = vpop.eup %2482 }
 0x6b5   :  { %v699_v31 = vmul.f32 %v2483_v30, %v2481_v25 }
 0x6b7   :  { %2290 = vmatmul.mubr.msk.f32.vlgmr.msra.gmra.mrb[14].mxu1 %vm194_vm2, %v699_v31 }
 0x6b8   :  { %2303 = vmatpush3.xpose.msk.msra.mxu1 %vm194_vm2, %v1017_v28  ;;  %2304 = vmatprep.mubr.msk.f32.mxu1 %vm2541_vm1, %v2540_v36 }
 0x6b9   :  { %2307 = vmatprep.subr.mxu1 %v2540_v36 }
 0x6bb   :  { %2305 = vmatmul.mubr.msk.f32.vlgmr.msra.gmra.mrb[16].mxu1 %vm194_vm2, %v1015_v32 }
 0x6bc   :  { %2308 = vmatpush3.xpose.msk.msra.mxu1 %vm194_vm2, %v1095_v33  ;;  %2309 = vmatprep.mubr.msk.f32.mxu1 %vm2541_vm1, %v2540_v36 }
 0x6bd   :  { %2317 = vmatprep.subr.mxu1 %v2540_v36 }
 0x6bf   :  { %2310 = vmatmul.mubr.msk.f32.vlgmr.msra.gmra.mrb[18].mxu1 %vm194_vm2, %v1093_v34 }
 0x6c0   :  { %2319 = vmatprep.mubr.msk.f32.mxu1 %vm2541_vm1, %v2540_v36 }
 0x6de   :  { %v680_v35 = vpop.xlane.xlu1 %679 }
 0x6df   :  { %v684_v37 = vsub.f32 %v596_v16, %v680_v35 }
 0x6e1   :  { %v686_v38 = vmul.f32 1.442695, %v684_v37 }
 0x6e3   :  { %2484 = vpow2.f32 %v686_v38 }
 0x6ed   :  { %v2485_v40 = vpop.eup %2484 }
 0x6ee   :  { %v690_v42 = vsel %vm194_vm2, %v2485_v40, 0.0 }
 0x6ef   :  { %691 = vadd.xlane.f32.xlu0 %v690_v42 }
 0x705   :  { %700 = vrot.lane.b32.xlu0 %v2675_v41, %s2547_s26 }
 0x709   :  { %1268 = vrot.lane.b32.xlu0 %v2673_v39, %s2549_s28 }
 0x70d   :  { %1429 = vrot.lane.b32.xlu0 %v2675_v41, %s2550_s0 }
 0x711   :  { %1507 = vrot.lane.b32.xlu0 %v2673_v39, %s2550_s0 }
 0x715   :  { %1427 = vrot.lane.b32.xlu0 %v2681_v43, %s2551_s29 }
 0x77c   :  { %v692_v44 = vpop.xlane.xlu0 %691 }
 0x77d   :  { %2486 = vrcp.f32 %v692_v44 }
 0x780   :  { %v701_v46 = vpop.permute.xlu0 %700 }
 0x781   :  { %2283 = vmatpush3.msra.mxu0 %v701_v46 }
 0x782   :  { %2292 = vmatprep.subr.mxu0 %v188_v57 }
 0x784   :  { %v1269_v47 = vpop.permute.xlu0 %1268 }
 0x785   :  { %2318 = vmatpush3.msra.mxu1 %v1269_v47 }
 0x786   :  { %2327 = vmatprep.subr.mxu1 %v2540_v36 }
 0x787   :  { %v2487_v48 = vpop.eup %2486 }
 0x788   :  { %v698_v49 = vmul.f32 %v2487_v48, %v2485_v40  ;;  %v1430_v13 = vpop.permute.xlu0 %1429 }
 0x78a   :  { %2285 = vmatmul.mubr.msk.f32.vlgmr.msra.gmra.mrb[0].mxu0 %vm194_vm2, %v698_v49  ;;  %v848_v50 = vpop.f32.mrb[14].mxu1 }
 0x78b   :  { %v2291_v51 = vpop.f32.mrb[15].mxu1  ;;  %2293 = vmatpush3.msra.mxu0 %v188_v57 }
 0x78c   :  { %2297 = vmatprep.subr.mxu0 %v187_v58  ;;  %v1508_v16 = vpop.permute.xlu0 %1507  ;;  %v190_v51 = vld [vmem:[%s2933_s3 + $0x18] sm:$0xff] }
 0x78e   :  { %v1088_v52 = vpop.f32.mrb[16].mxu1 }
 0x78f   :  { %v2306_v53 = vpop.f32.mrb[17].mxu1  ;;  %v1170_v54 = vsel %vm194_vm2, %v1088_v52, -inf }
 0x790   :  { %1171 = vmax.xlane.f32.xlu1 %v1170_v54  ;;  %v1428_v18 = vpop.permute.xlu0 %1427 }
 0x792   :  { %v1166_v43 = vpop.f32.mrb[18].mxu1 }
 0x793   :  { %v2311_v55 = vpop.f32.mrb[19].mxu1  ;;  %v1173_v56 = vsel %vm194_vm2, %v1166_v43, -inf }
 0x794   :  { %1174 = vmax.xlane.f32.xlu1 %v1173_v56  ;;  %v2158_v55 = vld [vmem:[%s2934_s4] ss:$0 sm:$0xff] }
 0x81d   :  { %v1172_v59 = vpop.xlane.xlu1 %1171 }
 0x81e   :  { %v1176_v60 = vsub.f32 %v1088_v52, %v1172_v59 }
 0x820   :  { %v1178_v61 = vmul.f32 1.442695, %v1176_v60 }
 0x821   :  { %v1175_v62 = vpop.xlane.xlu1 %1174 }
 0x822   :  { %2488 = vpow2.f32 %v1178_v61  ;;  %v1177_v63 = vsub.f32 %v1166_v43, %v1175_v62 }
 0x824   :  { %v1180_v2 = vmul.f32 1.442695, %v1177_v63 }
 0x826   :  { %2490 = vpow2.f32 %v1180_v2 }
 0x82c   :  { %v2489_v3 = vpop.eup %2488 }
 0x82d   :  { %v1182_v4 = vsel %vm194_vm2, %v2489_v3, 0.0 }
 0x82e   :  { %1183 = vadd.xlane.f32.xlu1 %v1182_v4 }
 0x830   :  { %v2491_v5 = vpop.eup %2490 }
 0x831   :  { %v1185_v6 = vsel %vm194_vm2, %v2491_v5, 0.0 }
 0x832   :  { %1186 = vadd.xlane.f32.xlu1 %v1185_v6 }
 0x843   :  { %1192 = vrot.lane.b32.xlu1 %v2675_v41, %s2549_s28 }
 0x847   :  { %1505 = vrot.lane.b32.xlu1 %v2690_v45, %s2551_s29 }
 0x85d   :  { %v772_v7 = vpop.f32.mrb[0].mxu0 }
 0x85e   :  { %v2286_v8 = vpop.f32.mrb[1].mxu0  ;;  %2294 = vmatprep.mubr.msk.f32.mxu0 %vm194_vm2, %v772_v7 }
 0x85f   :  { %2295 = vmatmul.mubr.msk.f32.vlgmr.msra.gmra.mrb[2].mxu0 %vm194_vm2, %v848_v50 }
 0x860   :  { %2299 = vmatprep.mubr.msk.f32.mxu0 %vm194_vm2, %v2727_v12  ;;  %2298 = vmatpush3.msra.mxu0 %v187_v58 }
 0x861   :  { %2312 = vmatprep.subr.mxu0 %v2540_v36 }
 0x867   :  { %2300 = vmatmul.mubr.msk.f32.vlgmr.msra.gmra.mrb[2].mxu0 %vm194_vm2, %v2729_v14 }
 0x868   :  { %2314 = vmatprep.mubr.msk.f32.mxu0 %vm2541_vm1, %v2540_v36 }
 0x8bb   :  { %v1184_v9 = vpop.xlane.xlu1 %1183 }
 0x8bc   :  { %2492 = vrcp.f32 %v1184_v9  ;;  %v1895_v9 = vld [vmem:[%s2939_s9] sm:$0xff] }
 0x8bf   :  { %v1187_v45 = vpop.xlane.xlu1 %1186 }
 0x8c0   :  { %2494 = vrcp.f32 %v1187_v45  ;;  %v1896_v45 = vld [vmem:[%s2939_s9 + $0x8] sm:$0xff] }
 0x8c3   :  { %v1193_v11 = vpop.permute.xlu1 %1192 }
 0x8c4   :  { %2313 = vmatpush3.msra.mxu0 %v1193_v11  ;;  %v1897_v11 = vld [vmem:[%s2939_s9 + $0x10] sm:$0xff] }
 0x8c5   :  { %2322 = vmatprep.subr.mxu0 %v189_v10 }
 0x8c6   :  { %v2493_v12 = vpop.eup %2492 }
 0x8c7   :  { %v1190_v15 = vmul.f32 %v2493_v12, %v2489_v3  ;;  %v1506_v23 = vpop.permute.xlu1 %1505 }
 0x8c9   :  { %2315 = vmatmul.mubr.msk.f32.vlgmr.msra.gmra.mrb[4].mxu0 %vm194_vm2, %v1190_v15 }
 0x8ca   :  { %v2495_v14 = vpop.eup %2494  ;;  %2323 = vmatpush3.msra.mxu0 %v189_v10  ;;  %v2406_v10 = vpack.c.bf16 %v1896_v45, %v1895_v9  ;;  %v2166_v45 = vld [vmem:[%s2942_s12] ss:$0 sm:$0xff] }
 0x8cb   :  { %v1191_v17 = vmul.f32 %v2495_v14, %v2491_v5  ;;  %2332 = vmatprep.subr.mxu0 %v2540_v36 }
 0x8cd   :  { %2320 = vmatmul.mubr.msk.f32.vlgmr.msra.gmra.mrb[20].mxu1 %vm194_vm2, %v1191_v17 }
 0x8ce   :  { %2328 = vmatpush3.xpose.msk.msra.mxu1 %vm194_vm2, %v1430_v13  ;;  %2329 = vmatprep.mubr.msk.f32.mxu1 %vm2541_vm1, %v2540_v36  ;;  %v1898_v13 = vld [vmem:[%s2939_s9 + $0x18] sm:$0xff] }
 0x8cf   :  { %2337 = vmatprep.subr.mxu1 %v2540_v36  ;;  %v2410_v12 = vpack.c.bf16 %v1898_v13, %v1897_v11 }
 0x8d1   :  { %2330 = vmatmul.mubr.msk.f32.vlgmr.msra.gmra.mrb[22].mxu1 %vm194_vm2, %v1428_v18 }
 0x8d2   :  { %2339 = vmatprep.mubr.msk.f32.mxu1 %vm2541_vm1, %v2540_v36 }
 0x99c   :  { %v1264_v19 = vpop.f32.mrb[4].mxu0 }
 0x99d   :  { %v2316_v20 = vpop.f32.mrb[5].mxu0  ;;  %2324 = vmatprep.mubr.msk.f32.mxu0 %vm194_vm2, %v1264_v19 }
 0x9a0   :  { %v1340_v21 = vpop.f32.mrb[20].mxu1 }
 0x9a1   :  { %v2321_v22 = vpop.f32.mrb[21].mxu1  ;;  %2325 = vmatmul.mubr.msk.f32.vlgmr.msra.gmra.mrb[2].mxu0 %vm194_vm2, %v1340_v21  ;;  %v2159_v21 = vld [vmem:[%s2937_s7] ss:$0 sm:$0xff] }
 0x9a2   :  { %2333 = vmatpush3.xpose.msk.msra.mxu0 %vm194_vm2, %v1508_v16  ;;  %2334 = vmatprep.mubr.msk.f32.mxu0 %vm2541_vm1, %v2540_v36 }
 0x9a3   :  { %2342 = vmatprep.subr.mxu0 %v2540_v36 }
 0x9a4   :  { %v1501_v24 = vpop.f32.mrb[22].mxu1 }
 0x9a5   :  { %v2331_v25 = vpop.f32.mrb[23].mxu1  ;;  %2335 = vmatmul.mubr.msk.f32.vlgmr.msra.gmra.mrb[6].mxu0 %vm194_vm2, %v1506_v23  ;;  %v1583_v26 = vsel %vm194_vm2, %v1501_v24, -inf }
 0x9a6   :  { %1584 = vmax.xlane.f32.xlu0 %v1583_v26  ;;  %2344 = vmatprep.mubr.msk.f32.mxu0 %vm2541_vm1, %v2540_v36  ;;  %v2160_v25 = vld [vmem:[%s2938_s8] ss:$0 sm:$0xff] }
 0xa33   :  { %v1585_v27 = vpop.xlane.xlu0 %1584 }
 0xa34   :  { %v1589_v28 = vsub.f32 %v1501_v24, %v1585_v27 }
 0xa36   :  { %v1591_v29 = vmul.f32 1.442695, %v1589_v28 }
 0xa38   :  { %2496 = vpow2.f32 %v1591_v29 }
 0xa42   :  { %v2497_v30 = vpop.eup %2496 }
 0xa43   :  { %v1595_v31 = vsel %vm194_vm2, %v2497_v30, 0.0 }
 0xa44   :  { %1596 = vadd.xlane.f32.xlu0 %v1595_v31  ;;  %v2004_v31 = vld [vmem:[%s2941_s11 + $0x8] sm:$0xff] }
 0xa78   :  { %v1579_v32 = vpop.f32.mrb[6].mxu0 }
 0xa79   :  { %v2336_v33 = vpop.f32.mrb[7].mxu0  ;;  %v1586_v34 = vsel %vm194_vm2, %v1579_v32, -inf }
 0xa7a   :  { %1587 = vmax.xlane.f32.xlu1 %v1586_v34  ;;  %v2005_v33 = vld [vmem:[%s2941_s11 + $0x10] sm:$0xff]  ;;  %v2006_v34 = vld [vmem:[%s2941_s11 + $0x18] sm:$0xff] }
 0xa8b   :  { %1681 = vrot.lane.b32.xlu1 %v2673_v39, %s2552_s19 }
 0xad1   :  { %v1597_v44 = vpop.xlane.xlu0 %1596 }
 0xb07   :  { %v1588_v35 = vpop.xlane.xlu1 %1587 }
 0xb08   :  { %v1590_v37 = vsub.f32 %v1579_v32, %v1588_v35  ;;  %v2418_v35 = vpack.c.bf16 %v2006_v34, %v2005_v33 }
 0xb0a   :  { %v1593_v38 = vmul.f32 1.442695, %v1590_v37  ;;  %v2007_v37 = vld [vmem:[%s2941_s11 + $0x20] sm:$0xff] }
 0xb0b   :  { %v1682_v36 = vpop.permute.xlu1 %1681 }
 0xb0c   :  { %2498 = vpow2.f32 %v1593_v38  ;;  %2343 = vmatpush3.msra.mxu0 %v1682_v36  ;;  %v2008_v38 = vld [vmem:[%s2941_s11 + $0x28] sm:$0xff] }
 0xb0d   :  { %2500 = vrcp.f32 %v1597_v44  ;;  %2347 = vmatprep.subr.mxu0 %v190_v51  ;;  %v2422_v36 = vpack.c.bf16 %v2008_v38, %v2007_v37 }
 0xb16   :  { %v2499_v40 = vpop.eup %2498 }
 0xb17   :  { %v1598_v42 = vsel %vm194_vm2, %v2499_v40, 0.0  ;;  %v2501_v47 = vpop.eup %2500 }
 0xb18   :  { %1599 = vadd.xlane.f32.xlu0 %v1598_v42  ;;  %v1603_v48 = vmul.f32 %v2501_v47, %v2497_v30  ;;  %v2003_v30 = vld [vmem:[%s2941_s11] sm:$0xff]  ;;  %v2010_v42 = vld [vmem:[%s2941_s11 + $0x38] sm:$0xff]  ;;  %v2012_v47 = vld [vmem:[%s2941_s11 + $0x48] sm:$0xff] }
 0xb19   :  { %v2414_v32 = vpack.c.bf16 %v2004_v31, %v2003_v30 }
 0xb2e   :  { %1605 = vrot.lane.b32.xlu0 %v2675_v41, %s2552_s19 }
 0xba5   :  { %v1600_v46 = vpop.xlane.xlu0 %1599 }
 0xba6   :  { %2502 = vrcp.f32 %v1600_v46  ;;  %v2011_v46 = vld [vmem:[%s2941_s11 + $0x40] sm:$0xff] }
 0xba9   :  { %v1606_v49 = vpop.permute.xlu0 %1605 }
 0xbaa   :  { %2338 = vmatpush3.msra.mxu1 %v1606_v49  ;;  %v2013_v49 = vld [vmem:[%s2941_s11 + $0x50] sm:$0xff] }
 0xbab   :  { %2340 = vmatmul.mubr.msk.f32.vlgmr.msra.gmra.mrb[24].mxu1 %vm194_vm2, %v1603_v48  ;;  %2407 = vmatprep.subr.bf16.mxu1 %v2406_v10  ;;  %v2430_v48 = vpack.c.bf16 %v2012_v47, %v2011_v46 }
 0xbac   :  { %2409 = vmatpush3.bf16.msra.mxu1 %v2406_v10 }
 0xbad   :  { %2411 = vmatprep.subr.bf16.mxu1 %v2410_v12 }
 0xbb0   :  { %v2503_v39 = vpop.eup %2502  ;;  %2413 = vmatpush3.bf16.msra.mxu1 %v2410_v12 }
 0xbb1   :  { %v1604_v50 = vmul.f32 %v2503_v39, %v2499_v40  ;;  %v2009_v40 = vld [vmem:[%s2941_s11 + $0x30] sm:$0xff]  ;;  %v2014_v39 = vld [vmem:[%s2941_s11 + $0x58] sm:$0xff] }
 0xbb2   :  { %v2426_v44 = vpack.c.bf16 %v2010_v42, %v2009_v40 }
 0xbb3   :  { %2345 = vmatmul.mubr.msk.f32.vlgmr.msra.gmra.mrb[8].mxu0 %vm194_vm2, %v1604_v50  ;;  %v2434_v50 = vpack.c.bf16 %v2014_v39, %v2013_v49 }
 0xbb4   :  { %2348 = vmatpush3.msra.mxu0 %v190_v51  ;;  %v2015_v51 = vld [vmem:[%s2941_s11 + $0x60] sm:$0xff] }
 0xbb5   :  { %2415 = vmatprep.subr.bf16.mxu0 %v2414_v32 }
 0xc7e   :  { %v1677_v41 = vpop.f32.mrb[24].mxu1 }
 0xc7f   :  { %v2341_v52 = vpop.f32.mrb[25].mxu1  ;;  %2349 = vmatprep.mubr.msk.f32.mxu0 %vm194_vm2, %v1677_v41  ;;  %v2016_v41 = vld [vmem:[%s2941_s11 + $0x68] sm:$0xff] }
 0xc80   :  { %v2438_v52 = vpack.c.bf16 %v2016_v41, %v2015_v51 }
 0xc86   :  { %v1753_v53 = vpop.f32.mrb[8].mxu0 }
 0xc87   :  { %v2346_v54 = vpop.f32.mrb[9].mxu0  ;;  %2350 = vmatmul.mubr.msk.f32.vlgmr.msra.gmra.mrb[2].mxu0 %vm194_vm2, %v1753_v53  ;;  %v2017_v53 = vld [vmem:[%s2941_s11 + $0x70] sm:$0xff] }
 0xc88   :  { %2417 = vmatpush3.bf16.msra.mxu0 %v2414_v32  ;;  %v2018_v54 = vld [vmem:[%s2941_s11 + $0x78] sm:$0xff] }
 0xc89   :  { %2419 = vmatprep.subr.bf16.mxu0 %v2418_v35 }
 0xc8c   :  { %2421 = vmatpush3.bf16.msra.mxu0 %v2418_v35 }
 0xc8d   :  { %2423 = vmatprep.subr.bf16.mxu0 %v2422_v36 }
 0xc90   :  { %2425 = vmatpush3.bf16.msra.mxu0 %v2422_v36 }
 0xc91   :  { %2427 = vmatprep.subr.bf16.mxu0 %v2426_v44 }
 0xc94   :  { %2429 = vmatpush3.bf16.msra.mxu0 %v2426_v44 }
 0xc95   :  { %2431 = vmatprep.subr.bf16.mxu0 %v2430_v48 }
 0xc98   :  { %2433 = vmatpush3.bf16.msra.mxu0 %v2430_v48 }
 0xc99   :  { %2435 = vmatprep.subr.bf16.mxu0 %v2434_v50 }
 0xc9c   :  { %2437 = vmatpush3.bf16.msra.mxu0 %v2434_v50 }
 0xc9d   :  { %2439 = vmatprep.subr.bf16.mxu0 %v2438_v52 }
 0xca0   :  { %2441 = vmatpush3.bf16.msra.mxu0 %v2438_v52 }
 0xd5a   :  { %v2351_v43 = vpop.f32.mrb[2].mxu0 }
 0xd5b   :  { %v1841_v56 = vadd.f32 %v2351_v43, %v2634_v1  ;;  %v1829_v57 = vpop.f32.mrb[3].mxu0  ;;  %v2442_v43 = vpack.c.bf16 %v2018_v54, %v2017_v53 }
 0xd5c   :  { %v1840_v58 = vadd.f32 %v1829_v57, %v2629_v0 }
 0xd5d   :  { %v2828_v59 = vadd.f32 %v2158_v55, %v1841_v56  ;;  %2443 = vmatprep.subr.bf16.mxu0 %v2442_v43 }
 0xd5e   :  { %v2830_v60 = vadd.f32 %v2158_v55, %v1840_v58  ;;  %2445 = vmatpush3.bf16.msra.mxu0 %v2442_v43  ;;  %v2161_v55 = vld [vmem:[%s2940_s10] ss:$0 sm:$0xff] }
 0xd5f   :  { %v1856_v61 = vsel %vm49_vm0, %v2828_v59, 0.0 }
 0xd60   :  { %1857 = vadd.xlane.f32.xlu0 %v1856_v61  ;;  %v1853_v62 = vsel %vm49_vm0, %v2830_v60, 0.0 }
 0xd61   :  { %1854 = vadd.xlane.f32.xlu1 %v1853_v62 }
 0xded   :  { %v1858_v63 = vpop.xlane.xlu0 %1857 }
 0xdee   :  { %v1860_v2 = vmul.f32 0.03125, %v1858_v63  ;;  %v1855_v3 = vpop.xlane.xlu1 %1854 }
 0xdef   :  { %v1859_v4 = vmul.f32 0.03125, %v1855_v3 }
 0xdf0   :  { %v1862_v1 = vsub.f32 %v2828_v59, %v1860_v2 }
 0xdf1   :  { %v1861_v0 = vsub.f32 %v2830_v60, %v1859_v4 }
 0xdf2   :  { %v1864_v5 = vmul.f32 %v1862_v1, %v1862_v1 }
 0xdf3   :  { %v1863_v6 = vmul.f32 %v1861_v0, %v1861_v0 }
 0xdf4   :  { %v1868_v7 = vsel %vm49_vm0, %v1864_v5, 0.0 }
 0xdf5   :  { %1869 = vadd.xlane.f32.xlu1 %v1868_v7  ;;  %v1865_v8 = vsel %vm49_vm0, %v1863_v6, 0.0 }
 0xdf6   :  { %1866 = vadd.xlane.f32.xlu0 %v1865_v8 }
 0xe82   :  { %v1870_v15 = vpop.xlane.xlu1 %1869 }
 0xe83   :  { %v1872_v14 = vmul.f32 0.03125, %v1870_v15  ;;  %v1867_v16 = vpop.xlane.xlu0 %1866 }
 0xe84   :  { %v1871_v17 = vmul.f32 0.03125, %v1867_v16 }
 0xe85   :  { %v1874_v18 = vadd.f32 1e-05, %v1872_v14 }
 0xe86   :  { %v1873_v19 = vadd.f32 1e-05, %v1871_v17 }
 0xe87   :  { %2504 = vrsqrt.f32 %v1874_v18 }
 0xe88   :  { %2506 = vrsqrt.f32 %v1873_v19 }
 0xe91   :  { %v2505_v20 = vpop.eup %2504 }
 0xe92   :  { %v2507_v22 = vpop.eup %2506  ;;  %v1878_v23 = vmul.f32 %v2505_v20, %v1862_v1 }
 0xe93   :  { %v1877_v24 = vmul.f32 %v2507_v22, %v1861_v0 }
 0xe94   :  { %v1886_v26 = vmul.f32 %v2159_v21, %v1878_v23 }
 0xe95   :  { %v1885_v27 = vmul.f32 %v2159_v21, %v1877_v24 }
 0xe96   :  { %v1894_v29 = vadd.f32 %v2160_v25, %v1886_v26 }
 0xe97   :  { %v1893_v28 = vadd.f32 %v2160_v25, %v1885_v27 }
 0xe99   :  { %2360 = vmatprep.mubr.msk.f32.mxu1 %vm49_vm0, %v1893_v28 }
 0xe9a   :  { %2361 = vmatmul.mubr.msk.f32.vlgmr.msra.gmra.mrb[26].mxu1 %vm49_vm0, %v1894_v29 }
 0xf6d   :  { %v2362_v56 = vpop.f32.mrb[26].mxu1 }
 0xf6e   :  { %v1984_v57 = vadd.f32 %v2362_v56, %v2161_v55  ;;  %v1978_v58 = vpop.f32.mrb[27].mxu1 }
 0xf6f   :  { %v1979_v61 = vadd.f32 %v2161_v55, %v1978_v58 }
 0xf70   :  { %v2165_v62 = vmul.f32 -1.702, %v1984_v57 }
 0xf71   :  { %v2164_v63 = vmul.f32 -1.702, %v1979_v61 }
 0xf72   :  { %v1993_v2 = vmul.f32 1.442695, %v2165_v62 }
 0xf73   :  { %v1991_v3 = vmul.f32 1.442695, %v2164_v63 }
 0xf74   :  { %2508 = vpow2.f32 %v1993_v2 }
 0xf75   :  { %2510 = vpow2.f32 %v1991_v3 }
 0xf7e   :  { %v2509_v4 = vpop.eup %2508 }
 0xf7f   :  { %v2511_v1 = vpop.eup %2510  ;;  %v1996_v0 = vadd.f32 1.0, %v2509_v4 }
 0xf80   :  { %v1995_v5 = vadd.f32 1.0, %v2511_v1 }
 0xf81   :  { %2512 = vrcp.f32 %v1996_v0 }
 0xf82   :  { %2514 = vrcp.f32 %v1995_v5 }
 0xf8b   :  { %v2513_v6 = vpop.eup %2512 }
 0xf8c   :  { %v2515_v7 = vpop.eup %2514  ;;  %v2002_v9 = vmul.f32 %v2513_v6, %v1984_v57 }
 0xf8d   :  { %v2001_v8 = vmul.f32 %v2515_v7, %v1979_v61 }
 0xf8f   :  { %2395 = vmatprep.mubr.f32.mxu0 %v2001_v8 }
 0xf90   :  { %2396 = vmatmul.mubr.f32.vlgmr.msra.gmra.mrb[10].mxu0 %v2002_v9 }
0x1063   :  { %v2397_v10 = vpop.f32.mrb[10].mxu0 }
0x1064   :  { %v2098_v11 = vadd.f32 %v2397_v10, %v2166_v45  ;;  %v2092_v13 = vpop.f32.mrb[11].mxu0 }
0x1065   :  { %v2093_v12 = vadd.f32 %v2166_v45, %v2092_v13 }
0x1066   :  { %v2102_v15 = vadd.f32 %v2098_v11, %v2828_v59 }
0x1067   :  { %v2101_v14 = vadd.f32 %v2093_v12, %v2830_v60 }
0x1068   :  { %2104 = vst.msk [vmem:[#allocation2 + $0x8] sm:$0xff] %vm49_vm0, %v2102_v15 }
0x1069   :  { %2103 = vst.msk [vmem:[#allocation2] sm:$0xff] %vm49_vm0, %v2101_v14 }
0x106a   :  { %2527 = shalt.err (!%p2524_p4)
}
0x106b   :  { %s2528_s20 = scalar_lea.hbm %s2943_s13, 256 }
0x106c   :  { %p2529_p5 = scmp.ne.s32.totalorder %s2943_s13, %s2528_s20  ;;  %p2532_p6 = scmp.lt.u32.totalorder %s2528_s20, %s2943_s13 }
0x106e   :  { %p2534_p7 = pnand %p2532_p6, %p2529_p5 }
0x1070   :  { %2537 = shalt.err (!%p2534_p7)
}
0x1071   :  { %s2554_s4 = smov 128   ;;  %s2555_s6 = smov 8  }
0x1072   :  { %2116 = dma.vmem_to_hbm [thread:$0]  %s2111_s17, 256, %s2943_s13, [#allocation3], %s2554_s4, %s2554_s4, %s2555_s6  }
0x1073   :  { %2538 = dma.done.wait [#allocation3], 256  }
0x1074   :  { %2539 = vsyncadd [#allocation3], 4294967040 }
0x1075   :  { %2120 = vsyncpa [#allocation3], 1 }

</bundles_post_ra>
